<compile_context>
chip_gen: v7x
topology: tpu7x:2x2x1
jax: 0.10.0
libtpu: 0.0.40
codegen_flags: <defaults>
</compile_context>

<pallas_src>
import functools

import jax
import jax.numpy as jnp
from jax.experimental import pallas as pl
from jax.experimental.pallas import tpu as pltpu


def make_kernel(num_actions: int, num_discrete: int):
    A, D = num_actions, num_discrete

    def kernel(x_ref, w1_ref, wh_ref, out_ref):
        one = jnp.ones((1, 1), jnp.float32)

        # common = relu([state | 1] @ [W1; b1])              -> (1, hidden)
        x_aug = jnp.concatenate([x_ref[...], one], axis=1)
        common = jnp.maximum(
            jnp.dot(x_aug, w1_ref[...], preferred_element_type=jnp.float32), 0.0)

        # Fused heads: [common | 1] @ [[Wa | Wc]; [ba | bc]]  -> (1, A*D + 1)
        common_aug = jnp.concatenate([common, one], axis=1)
        heads = jnp.dot(common_aug, wh_ref[...],
                        preferred_element_type=jnp.float32)

        logits = heads[:, :A * D]                 # (1, A*D)
        value = heads[:, A * D:A * D + 1]         # (1, 1)

        # logits.view(A, D) without an in-kernel reshape: sublane-concatenate
        # the A static lane slices (each starts at a multiple of D).
        rows = jnp.concatenate(
            [logits[:, a * D:(a + 1) * D] for a in range(A)], axis=0)  # (A, D)

        # Row-wise softmax (numerically stable), vectorized over the A sublanes.
        m = jnp.max(rows, axis=1, keepdims=True)
        e = jnp.exp(rows - m)
        probs = e / jnp.sum(e, axis=1, keepdims=True)                  # (A, D)

        # Single contiguous output slab: rows 0..A-1 = policy, row A = [value, 0..].
        value_row = jnp.concatenate(
            [value, jnp.zeros((1, D - 1), jnp.float32)], axis=1)       # (1, D)
        out_ref[...] = jnp.concatenate([probs, value_row], axis=0)     # (A+1, D)

    return kernel


def prepare_params(params, num_actions: int, num_discrete: int):
    """One-time packing of parameters (hoisted out of the per-step path)."""
    w1, b1 = params["w1"], params["b1"]   # (NI, H), (H,)
    wc, bc = params["wc"], params["bc"]   # (H, 1), (1,)
    wa, ba = params["wa"], params["ba"]   # (H, A*D), (A*D,)

    hidden = w1.shape[1]
    assert wc.shape == (hidden, 1)
    assert wa.shape == (hidden, num_actions * num_discrete)
    assert ba.shape == (num_actions * num_discrete,)

    # b1 folded as an extra input row (state gets a constant-1 lane in-kernel).
    w1_aug = jnp.concatenate([w1, b1[None, :]], axis=0)                # (NI+1, H)

    # Heads fused actor-first: [Wa | Wc] with [ba | bc] folded as an extra row.
    w_heads = jnp.concatenate([wa, wc], axis=1)                        # (H, A*D+1)
    b_heads = jnp.concatenate([ba, bc])[None, :]                       # (1, A*D+1)
    w_heads_aug = jnp.concatenate([w_heads, b_heads], axis=0)          # (H+1, A*D+1)

    return w1_aug.astype(jnp.float32), w_heads_aug.astype(jnp.float32)


@functools.partial(jax.jit, static_argnames=("num_actions", "num_discrete"))
def discrete_actor_critic_forward(state, w1_aug, w_heads_aug,
                                  num_actions: int, num_discrete: int):
    """state: (num_inputs,) -> (value (1,1), policy_dist (num_actions, num_discrete))."""
    num_inputs = state.shape[0]
    x = state.reshape(1, num_inputs).astype(jnp.float32)

    vmem = pl.BlockSpec(memory_space=pltpu.MemorySpace.VMEM)

    out = pl.pallas_call(
        make_kernel(num_actions, num_discrete),
        out_shape=jax.ShapeDtypeStruct((num_actions + 1, num_discrete), jnp.float32),
        in_specs=[vmem, vmem, vmem],
        out_specs=vmem,
    )(x, w1_aug, w_heads_aug)

    policy_dist = out[:num_actions, :]           # (A, D)
    value = out[num_actions:, 0:1]               # (1, 1)
    return value, policy_dist


def init_params(key, num_inputs, num_actions, hidden_size, num_discrete):
    # TODO(synk): utils.init_weights is not available; deterministic stand-in init.
    k1, k2, k3, k4, k5, k6 = jax.random.split(key, 6)
    scale = 0.1
    return {
        "w1": scale * jax.random.normal(k1, (num_inputs, hidden_size), jnp.float32),
        "b1": scale * jax.random.normal(k2, (hidden_size,), jnp.float32),
        "wc": scale * jax.random.normal(k3, (hidden_size, 1), jnp.float32),
        "bc": scale * jax.random.normal(k4, (1,), jnp.float32),
        "wa": scale * jax.random.normal(
            k5, (hidden_size, num_actions * num_discrete), jnp.float32),
        "ba": scale * jax.random.normal(k6, (num_actions * num_discrete,), jnp.float32),
    }


def reference_forward(state, params, num_actions, num_discrete):
    x = state.reshape(1, -1).astype(jnp.float32)
    common = jnp.maximum(x @ params["w1"] + params["b1"], 0.0)
    value = common @ params["wc"] + params["bc"]
    logits = (common @ params["wa"] + params["ba"]).reshape(num_actions, num_discrete)
    policy = jax.nn.softmax(logits, axis=1)
    return value, policy


if __name__ == "__main__":
    num_inputs, num_actions, hidden_size, num_discrete = 16, 4, 32, 16

    key = jax.random.PRNGKey(0)
    k_state, k_params = jax.random.split(key)
    state = jax.random.normal(k_state, (num_inputs,), jnp.float32)
    params = init_params(k_params, num_inputs, num_actions, hidden_size, num_discrete)

    # One-time parameter packing (not in the per-step path).
    w1_aug, w_heads_aug = prepare_params(params, num_actions, num_discrete)

    value, policy = discrete_actor_critic_forward(
        state, w1_aug, w_heads_aug, num_actions, num_discrete)
    jax.block_until_ready((value, policy))

    v_ref, p_ref = reference_forward(state, params, num_actions, num_discrete)
    assert value.shape == (1, 1)
    assert policy.shape == (num_actions, num_discrete)
    assert jnp.allclose(value, v_ref, atol=1e-5, rtol=1e-5)
    assert jnp.allclose(policy, p_ref, atol=1e-5, rtol=1e-5)
    assert jnp.allclose(policy.sum(axis=1), 1.0, atol=1e-5)

    print("KERNEL_OK")
</pallas_src>

<mosaic_0001>
module attributes {stable_mosaic.version = 11 : i64} {
  func.func @kernel(%arg0: memref<1x16xf32, #tpu.memory_space<vmem>>, %arg1: memref<17x32xf32, #tpu.memory_space<vmem>>, %arg2: memref<33x65xf32, #tpu.memory_space<vmem>>, %arg3: memref<5x16xf32, #tpu.memory_space<vmem>>) attributes {dimension_semantics = [], scalar_prefetch = 0 : i64, scratch_operands = 0 : i64, tpu.core_type = #tpu.core_type<tc>} {
    %cst = arith.constant 1.000000e+00 : f32
    %0 = vector.broadcast %cst : f32 to vector<1x1xf32>
    %c0 = arith.constant 0 : index
    %c0_0 = arith.constant 0 : index
    %1 = vector.load %arg0[%c0, %c0_0] : memref<1x16xf32, #tpu.memory_space<vmem>>, vector<1x16xf32>
    %2 = tpu.concatenate %1, %0 in 1 : vector<1x16xf32>, vector<1x1xf32> -> vector<1x17xf32>
    %c0_1 = arith.constant 0 : index
    %c0_2 = arith.constant 0 : index
    %3 = vector.load %arg1[%c0_1, %c0_2] : memref<17x32xf32, #tpu.memory_space<vmem>>, vector<17x32xf32>
    %cst_3 = arith.constant dense<0.000000e+00> : vector<1x32xf32>
    %4 = tpu.matmul %2, %3, %cst_3 {dimension_numbers = #tpu.dot_dimension_numbers<[1], [0], [0], [1], [0, 0, 1, 1], [], []>} : vector<1x17xf32>, vector<17x32xf32>, vector<1x32xf32> -> vector<1x32xf32>
    %cst_4 = arith.constant 0.000000e+00 : f32
    %5 = vector.broadcast %cst_4 : f32 to vector<1x32xf32>
    %6 = arith.maximumf %4, %5 : vector<1x32xf32>
    %7 = tpu.concatenate %6, %0 in 1 : vector<1x32xf32>, vector<1x1xf32> -> vector<1x33xf32>
    %c0_5 = arith.constant 0 : index
    %c0_6 = arith.constant 0 : index
    %8 = vector.load %arg2[%c0_5, %c0_6] : memref<33x65xf32, #tpu.memory_space<vmem>>, vector<33x65xf32>
    %cst_7 = arith.constant dense<0.000000e+00> : vector<1x65xf32>
    %9 = tpu.matmul %7, %8, %cst_7 {dimension_numbers = #tpu.dot_dimension_numbers<[1], [0], [0], [1], [0, 0, 1, 1], [], []>} : vector<1x33xf32>, vector<33x65xf32>, vector<1x65xf32> -> vector<1x65xf32>
    %10 = vector.extract_strided_slice %9 {offsets = [0, 0], sizes = [1, 64], strides = [1, 1]} : vector<1x65xf32> to vector<1x64xf32>
    %11 = vector.extract_strided_slice %9 {offsets = [0, 64], sizes = [1, 1], strides = [1, 1]} : vector<1x65xf32> to vector<1x1xf32>
    %12 = vector.extract_strided_slice %10 {offsets = [0, 0], sizes = [1, 16], strides = [1, 1]} : vector<1x64xf32> to vector<1x16xf32>
    %13 = vector.extract_strided_slice %10 {offsets = [0, 16], sizes = [1, 16], strides = [1, 1]} : vector<1x64xf32> to vector<1x16xf32>
    %14 = vector.extract_strided_slice %10 {offsets = [0, 32], sizes = [1, 16], strides = [1, 1]} : vector<1x64xf32> to vector<1x16xf32>
    %15 = vector.extract_strided_slice %10 {offsets = [0, 48], sizes = [1, 16], strides = [1, 1]} : vector<1x64xf32> to vector<1x16xf32>
    %16 = tpu.concatenate %12, %13, %14, %15 in 0 : vector<1x16xf32>, vector<1x16xf32>, vector<1x16xf32>, vector<1x16xf32> -> vector<4x16xf32>
    %cst_8 = arith.constant dense<0xFF800000> : vector<4xf32>
    %17 = vector.multi_reduction <maximumf>, %16, %cst_8 [1] : vector<4x16xf32> to vector<4xf32>
    %18 = vector.shape_cast %17 : vector<4xf32> to vector<4x1xf32>
    %19 = vector.broadcast %18 : vector<4x1xf32> to vector<4x16xf32>
    %20 = arith.subf %16, %19 : vector<4x16xf32>
    %21 = math.exp %20 : vector<4x16xf32>
    %cst_9 = arith.constant dense<0.000000e+00> : vector<4xf32>
    %22 = vector.multi_reduction <add>, %21, %cst_9 [1] : vector<4x16xf32> to vector<4xf32>
    %23 = vector.shape_cast %22 : vector<4xf32> to vector<4x1xf32>
    %24 = vector.broadcast %23 : vector<4x1xf32> to vector<4x16xf32>
    %25 = arith.divf %21, %24 : vector<4x16xf32>
    %cst_10 = arith.constant 0.000000e+00 : f32
    %26 = vector.broadcast %cst_10 : f32 to vector<1x15xf32>
    %27 = tpu.concatenate %11, %26 in 1 : vector<1x1xf32>, vector<1x15xf32> -> vector<1x16xf32>
    %28 = tpu.concatenate %25, %27 in 0 : vector<4x16xf32>, vector<1x16xf32> -> vector<5x16xf32>
    %c0_11 = arith.constant 0 : index
    %c0_12 = arith.constant 0 : index
    %29 = vector.load %arg3[%c0_11, %c0_12] : memref<5x16xf32, #tpu.memory_space<vmem>>, vector<5x16xf32>
    tpu.vector_store %arg3[%c0_11, %c0_12], %28 {strides = array<i32>} : memref<5x16xf32, #tpu.memory_space<vmem>>, vector<5x16xf32>,
    return
  }
}

</mosaic_0001>

<bundles_post_ra>
// kernel: discrete_actor_critic_forward.1
= control target key start
LH: loop header
LB: loop body
LE: loop exit
PB: predicated region body
PF: predicated region fallthrough
CT: control target
= control target key end

     0   :  { %8 = vsyncpa [#allocation3], 0  ;;  %s431_s0 = inlined_call_operand.vmem [shape: f32[1,16], index: 0, kind: input, shape index: {}]   ;;  %s432_s1 = inlined_call_operand.hbm [shape: f32[17,32], index: 1, kind: input, shape index: {}]   ;;  %s433_s2 = inlined_call_operand.hbm [shape: f32[33,65], index: 2, kind: input, shape index: {}]   ;;  %s434_s3 = inlined_call_operand.vmem [shape: f32[5,16], index: 3, kind: output, shape index: {}]  }
   0x1   :  { %9 = vsyncpa [#allocation5], 0  ;;  %s367_s12 = smov [#allocation2]   ;;  %s319_s16 = scalar_lea.hbm %s432_s1, 384 }
   0x2   :  { %s17_s13 = sshll.u32 %s367_s12, 4  ;;  %p320_p0 = scmp.ne.s32.totalorder %s432_s1, %s319_s16  ;;  %s18_s13 = int_to_ptr.vmem [resolvable:$true] %s17_s13 }
   0x3   :  { %p323_p1 = scmp.lt.u32.totalorder %s319_s16, %s432_s1 }
   0x5   :  { %p325_p2 = pnand %p323_p1, %p320_p0 }
   0x7   :  { %328 = shalt.err (!%p325_p2)
}
   0x8   :  { %s329_s21 = scalar_lea.vmem %s18_s13, 384  ;;  %p334_p4 = scmp.lt.s32.totalorder %s18_s13, %s18_s13 }
   0x9   :  { %p330_p3 = scmp.ne.s32.totalorder %s18_s13, %s329_s21  ;;  %p335_p5 = scmp.lt.s32.totalorder %s329_s21, %s329_s21 }
   0xb   :  { %p336_p6 = por %p335_p5, %p334_p4 }
   0xd   :  { %p337_p7 = pnand %p336_p6, %p330_p3 }
   0xf   :  { %340 = shalt.err (!%p337_p7)
}
  0x10   :  { %s368_s22 = smov 128   ;;  %s369_s23 = smov 8  }
  0x11   :  { %23 = dma.hbm_to_vmem [thread:$0]  %s432_s1, 384, %s18_s13, [#allocation3], %s368_s22, %s368_s22, %s369_s23  }
  0x12   :  { %s370_s26 = smov [#allocation4]   ;;  %s341_s30 = scalar_lea.hbm %s433_s2, 640 }
  0x13   :  { %s29_s27 = sshll.u32 %s370_s26, 4  ;;  %p342_p8 = scmp.ne.s32.totalorder %s433_s2, %s341_s30  ;;  %s30_s27 = int_to_ptr.vmem [resolvable:$true] %s29_s27 }
  0x14   :  { %p345_p9 = scmp.lt.u32.totalorder %s341_s30, %s433_s2 }
  0x16   :  { %p347_p10 = pnand %p345_p9, %p342_p8 }
  0x18   :  { %350 = shalt.err (!%p347_p10)
}
  0x19   :  { %s351_s8 = scalar_lea.vmem %s30_s27, 640  ;;  %p356_p12 = scmp.lt.s32.totalorder %s30_s27, %s30_s27 }
  0x1a   :  { %p352_p11 = scmp.ne.s32.totalorder %s30_s27, %s351_s8  ;;  %p357_p13 = scmp.lt.s32.totalorder %s351_s8, %s351_s8 }
  0x1c   :  { %p358_p0 = por %p357_p13, %p356_p12 }
  0x1e   :  { %p359_p1 = pnand %p358_p0, %p352_p11 }
  0x20   :  { %362 = shalt.err (!%p359_p1)
}
  0x21   :  { %35 = dma.hbm_to_vmem [thread:$0]  %s433_s2, 640, %s30_s27, [#allocation5], %s368_s22, %s368_s22, %s369_s23  }
  0x22   :  { %363 = dma.done.wait [#allocation3], 384  }
  0x23   :  { %364 = vsyncadd [#allocation3], 4294966912 }
  0x24   :  { %365 = dma.done.wait [#allocation5], 640  }
  0x25   :  { %366 = vsyncadd [#allocation5], 4294966656  ;;  %v371_v0 = vmov 0.0|0.0   ;;  %vm372_vm0 = vmmov 0   ;;  %v373_v1 = vmov 0.0   ;;  %v45_v2 = vld [vmem:[#allocation2] sm:$0xff] }
  0x26   :  { %295 = vmatprep.subr.bf16.mxu0 %v371_v0  ;;  %279 = vmatprep.mubr.msk.f32.mxu0 %vm372_vm0, %v373_v1  ;;  %v46_v3 = vld [vmem:[#allocation2 + $0x8] sm:$0xff]  ;;  %v129_v5 = vld [vmem:[#allocation4] sm:$0xff]  ;;  %v130_v6 = vld [vmem:[#allocation4 + $0x8] sm:$0xff]  ;;  %vm43_vm1 = vcmask 130048   ;;  %vm52_vm2 = vcmask 1040384   ;;  %vm48_vm3 = vcmask 138240  }
  0x27   :  { %298 = vmatprep.subr.bf16.mxu1 %v371_v0  ;;  %292 = vmatprep.mubr.msk.f32.mxu1 %vm372_vm0, %v373_v1  ;;  %v296_v4 = vpack.c.bf16 %v46_v3, %v45_v2  ;;  %v42_v7 = vld [vmem:[%s431_s0] sm:$0x1]  ;;  %v299_v8 = vpack.c.bf16 %v130_v6, %v129_v5  ;;  %v131_v9 = vld [vmem:[#allocation4 + $0x10] sm:$0xff]  ;;  %v132_v10 = vld [vmem:[#allocation4 + $0x18] sm:$0xff]  ;;  %vm127_vm4 = vcmask 261120   ;;  %vm134_vm5 = vcmask 269312  }
  0x28   :  { %v47_v11 = vld [vmem:[#allocation2 + $0x10] sm:$0x1]  ;;  %v302_v12 = vpack.c.bf16 %v132_v10, %v131_v9  ;;  %v44_v13 = vsel %vm43_vm1, %v42_v7, 1.0  ;;  %v133_v14 = vld [vmem:[#allocation4 + $0x20] sm:$0x1]  ;;  %s374_s0 = smov 80  }
  0x29   :  { %297 = vmatpush3.bf16.msra.mxu0 %v296_v4  ;;  %300 = vmatpush3.bf16.msra.mxu1 %v299_v8  ;;  %s375_s2 = smov 112   ;;  %s376_s12 = smov 96   ;;  %vm225_vm6 = vcmask 1041408   ;;  %vm227_vm7 = vcmask 1042432   ;;  %vm229_vm8 = vcmask 125952   ;;  %vm244_vm9 = vcmask 7168  }
  0x2a   :  { %277 = vmatprep.subr.mxu0 %v373_v1  ;;  %301 = vmatprep.subr.bf16.mxu1 %v371_v0  ;;  %s377_s13 = smov 64   ;;  %vm249_vm10 = vcmask 1043456   ;;  %vm251_vm11 = vcmask 126976  }
  0x2d   :  { %278 = vmatpush3.msk.msra.mxu0 %vm52_vm2, %v47_v11  ;;  %303 = vmatpush3.bf16.msra.mxu1 %v302_v12 }
  0x2e   :  { %280 = vmatmul.mubr.msk.f32.vlgmr.msra.gmra.mrb[0].mxu0 %vm48_vm3, %v44_v13  ;;  %290 = vmatprep.subr.mxu1 %v373_v1 }
  0x31   :  { %291 = vmatpush3.msk.msra.mxu1 %vm52_vm2, %v133_v14 }
 0x101   :  { %v122_v15 = vpop.f32.mrb[0].mxu0 }
 0x102   :  { %v126_v16 = vmax.f32 %v122_v15, 0.0  ;;  %v281_v17 = vpop.f32.mrb[1].mxu0 }
 0x104   :  { %v128_v18 = vsel %vm127_vm4, %v126_v16, 1.0 }
 0x105   :  { %293 = vmatmul.mubr.msk.f32.vlgmr.msra.gmra.mrb[0].mxu1 %vm134_vm5, %v128_v18 }
 0x1d8   :  { %v207_v19 = vpop.f32.mrb[0].mxu1 }
 0x1d9   :  { %v294_v20 = vpop.f32.mrb[1].mxu1  ;;  %v220_v21 = vrot.slane %v207_v19, 5  ;;  %v212_v22 = vrot.slane %v207_v19, 7  ;;  %v216_v23 = vrot.slane %v207_v19, 6 }
 0x1db   :  { %221 = vrot.lane.b32.xlu1 %v220_v21, %s374_s0  ;;  %213 = vrot.lane.b32.xlu0 %v212_v22, %s375_s2 }
 0x1df   :  { %217 = vrot.lane.b32.xlu0 %v216_v23, %s376_s12 }
 0x24d   :  { %v214_v24 = vpop.permute.xlu0 %213  ;;  %v222_v27 = vpop.permute.xlu1 %221 }
 0x24e   :  { %v224_v25 = vsel %vm52_vm2, %v207_v19, %v214_v24 }
 0x251   :  { %v218_v26 = vpop.permute.xlu0 %217 }
 0x252   :  { %v226_v28 = vsel %vm225_vm6, %v224_v25, %v218_v26 }
 0x253   :  { %v228_v29 = vsel %vm227_vm7, %v226_v28, %v222_v27 }
 0x254   :  { %v230_v30 = vsel %vm229_vm8, %v228_v29, -inf }
 0x255   :  { %231 = vmax.xlane.f32.xlu1 %v230_v30 }
 0x2e2   :  { %v232_v31 = vpop.xlane.xlu1 %231 }
 0x2e3   :  { %v233_v32 = vsub.f32 %v228_v29, %v232_v31 }
 0x2e5   :  { %v234_v33 = vmul.f32 1.442695, %v233_v32 }
 0x2e7   :  { %315 = vpow2.f32 %v234_v33 }
 0x2f1   :  { %v316_v34 = vpop.eup %315 }
 0x2f2   :  { %v236_v35 = vsel %vm229_vm8, %v316_v34, 0.0 }
 0x2f3   :  { %237 = vadd.xlane.f32.xlu0 %v236_v35 }
 0x309   :  { %241 = vrot.lane.b32.xlu0 %v207_v19, %s377_s13 }
 0x380   :  { %v238_v36 = vpop.xlane.xlu0 %237 }
 0x381   :  { %317 = vrcp.f32 %v238_v36 }
 0x384   :  { %v242_v37 = vpop.permute.xlu0 %241 }
 0x385   :  { %v245_v38 = vsel %vm244_vm9, %v242_v37, 0.0 }
 0x386   :  { %v247_v41 = vrot.slane %v245_v38, 4 }
 0x38b   :  { %v318_v39 = vpop.eup %317 }
 0x38c   :  { %v240_v40 = vmul.f32 %v318_v39, %v316_v34 }
 0x38e   :  { %v250_v42 = vsel %vm249_vm10, %v240_v40, %v247_v41 }
 0x38f   :  { %252 = vst.msk [vmem:[%s434_s3] sm:$0x1f] %vm251_vm11, %v250_v42 }
 0x390   :  { %257 = vsyncpa [#allocation3], 1 }
 0x391   :  { %258 = vsyncpa [#allocation5], 1 }

</bundles_post_ra>
